<compile_context>
chip_gen: v6e
topology: v6e:2x2x1
jax: 0.10.0
libtpu: 0.0.40
codegen_flags: <defaults>
</compile_context>

<pallas_src>
from functools import partial

import jax
import jax.numpy as jnp
from jax.experimental import pallas as pl
from jax.experimental.pallas import tpu as pltpu


def _gather_matmul_kernel(fidx_ref, table_ref, out_ref):
    """Gather-as-matmul: out[r, :] = onehot(fidx[r, :]) @ block_diag(table)."""
    tm = fidx_ref.shape[0]
    pack = fidx_ref.shape[1]
    K = table_ref.shape[0]

    fidx = fidx_ref[...]                                        # (tm, pack) int32
    col = jax.lax.broadcasted_iota(jnp.int32, (tm, K), 1)       # (tm, K)
    hit = col == fidx[:, 0:1]
    for j in range(1, pack):                                    # pack <= 4, unrolled
        hit = hit | (col == fidx[:, j:j + 1])
    onehot = hit.astype(jnp.float32)                            # (tm, K)

    out_ref[...] = jnp.dot(
        onehot, table_ref[...], preferred_element_type=jnp.float32
    ).astype(out_ref.dtype)


def _pick_row_tile(rows, want):
    """Largest 8-aligned tile <= want that divides rows (or the full row count)."""
    if rows <= want:
        return rows
    t = (want // 8) * 8
    while t >= 8:
        if rows % t == 0:
            return t
        t -= 8
    return rows


@partial(jax.jit,
         static_argnames=("scaler", "steps_per_day", "n_freq", "block_rows"))
def temporal_node_feature(tod, dow, emb_table, weight, bias, *,
                          scaler=1, steps_per_day=24, n_freq=1, block_rows=512):
    """tod, dow: (B, T). emb_table: (V, H). weight: (H, H) nn.Linear layout (out, in).
    bias: (H,). Returns (B, T, H) float32."""
    B, T = tod.shape
    V, H = emb_table.shape
    N = B * T

    # --- glue (plain JAX, fused under jit): index math + fold Linear/activation ---
    idx = (tod * scaler).astype(jnp.int32) + dow.astype(jnp.int32) * steps_per_day
    # NOTE: out-of-range idx yields an all-zero one-hot row (zero output) instead of
    # an error; inputs are assumed to be in [0, V) as in the torch module.
    fused = (jnp.dot(emb_table.astype(jnp.float32), weight.T.astype(jnp.float32),
                     precision=jax.lax.Precision.HIGHEST)
             + bias.astype(jnp.float32))                        # (V, H)
    if n_freq == 0:
        table = fused
    elif n_freq == H:
        table = jnp.sin(fused)
    else:
        table = jnp.concatenate([fused[:, n_freq:], jnp.sin(fused[:, :n_freq])],
                                axis=-1)

    # --- pack rows so the kernel output last dim is 128 lanes (unmasked stores) ---
    pack = 128 // H if (128 % H == 0 and N % max(1, 128 // H) == 0) else 1
    rows = N // pack
    table_wide = jnp.kron(jnp.eye(pack, dtype=jnp.float32), table)       # (pack*V, pack*H)
    fidx = (idx.reshape(rows, pack)
            + (jnp.arange(pack, dtype=jnp.int32) * V)[None, :])          # (rows, pack)

    tm = _pick_row_tile(rows, max(1, block_rows // pack))
    K, Hw = table_wide.shape

    out = pl.pallas_call(
        _gather_matmul_kernel,
        out_shape=jax.ShapeDtypeStruct((rows, Hw), jnp.float32),
        grid=(rows // tm,),
        in_specs=[
            pl.BlockSpec((tm, pack), lambda i: (i, 0)),   # packed, offset indices
            pl.BlockSpec((K, Hw), lambda i: (0, 0)),      # fused table (VMEM-resident)
        ],
        out_specs=pl.BlockSpec((tm, Hw), lambda i: (i, 0)),
        compiler_params=pltpu.CompilerParams(dimension_semantics=("parallel",)),
    )(fidx, table_wide)

    return out.reshape(B, T, H)


def _reference(tod, dow, emb_table, weight, bias, *, scaler, steps_per_day, n_freq):
    idx = (tod * scaler).astype(jnp.int32) + dow.astype(jnp.int32) * steps_per_day
    x_emb = emb_table[idx]                                   # (B, T, H)
    x_w = jnp.dot(x_emb, weight.T,
                  precision=jax.lax.Precision.HIGHEST) + bias
    H = emb_table.shape[1]
    if n_freq == 0:
        return x_w
    if n_freq == H:
        return jnp.sin(x_w)
    return jnp.concatenate([x_w[..., n_freq:], jnp.sin(x_w[..., :n_freq])], axis=-1)


if __name__ == "__main__":
    hidden_size = 32
    steps_per_day = 24
    vocab_size = steps_per_day * 7          # 7 days of temporal slots
    scaler = 1

    key = jax.random.PRNGKey(0)
    _, k_emb, k_w, k_b = jax.random.split(key, 4)

    emb_table = jax.random.normal(k_emb, (vocab_size, hidden_size), dtype=jnp.float32)
    bound = 1.0 / (hidden_size ** 0.5)
    weight = jax.random.uniform(k_w, (hidden_size, hidden_size), minval=-bound,
                                maxval=bound, dtype=jnp.float32)
    bias = jax.random.uniform(k_b, (hidden_size,), minval=-bound, maxval=bound,
                              dtype=jnp.float32)

    def check(B, T, n_freq, block_rows):
        kt, kd = jax.random.split(jax.random.fold_in(key, B * 1009 + T * 13 + n_freq), 2)
        tod = jax.random.uniform(kt, (B, T), minval=0.0, maxval=float(steps_per_day),
                                 dtype=jnp.float32)
        dow = jax.random.randint(kd, (B, T), 0, 7, dtype=jnp.int32)
        out = temporal_node_feature(tod, dow, emb_table, weight, bias,
                                    scaler=scaler, steps_per_day=steps_per_day,
                                    n_freq=n_freq, block_rows=block_rows)
        out = jax.block_until_ready(out)
        ref = _reference(tod, dow, emb_table, weight, bias,
                         scaler=scaler, steps_per_day=steps_per_day, n_freq=n_freq)
        assert out.shape == (B, T, hidden_size)
        assert jnp.allclose(out, ref, atol=1e-5, rtol=1e-5), \
            f"mismatch vs reference (B={B}, T={T}, n_freq={n_freq})"

    # primary small config (module default n_freq=1)
    check(2, 8, n_freq=1, block_rows=512)
    # interior n_freq pins the slice/concat direction; plus both edge cases
    check(2, 8, n_freq=8, block_rows=512)
    check(2, 8, n_freq=0, block_rows=512)
    check(2, 8, n_freq=hidden_size, block_rows=512)
    # multi-step grid (exercises the parallel grid path / dual-TC sharding)
    check(2, 48, n_freq=1, block_rows=32)

    print("KERNEL_OK")
</pallas_src>

<mosaic_0001>
module attributes {stable_mosaic.version = 11 : i64} {
  func.func @_gather_matmul_kernel(%arg0: i32, %arg1: memref<4x4xi32, #tpu.memory_space<vmem>>, %arg2: memref<672x128xf32, #tpu.memory_space<vmem>>, %arg3: memref<4x128xf32, #tpu.memory_space<vmem>>) attributes {dimension_semantics = [#tpu.dimension_semantics<parallel>], iteration_bounds = array<i64: 1>, scalar_prefetch = 0 : i64, scratch_operands = 0 : i64, tpu.core_type = #tpu.core_type<tc>, window_params = [{transform_indices = @transform_0, window_bounds = array<i64: 4, 4>}, {pipeline_mode = #tpu.pipeline_mode<synchronous>, transform_indices = @transform_1, window_bounds = array<i64: 672, 128>}, {transform_indices = @transform_2, window_bounds = array<i64: 4, 128>}]} {
    %c0 = arith.constant 0 : index
    %c0_0 = arith.constant 0 : index
    %0 = vector.load %arg1[%c0, %c0_0] : memref<4x4xi32, #tpu.memory_space<vmem>>, vector<4x4xi32>
    %1 = tpu.iota {dimensions = array<i32: 1>} : vector<4x672xi32>
    %2 = vector.extract_strided_slice %0 {offsets = [0, 0], sizes = [4, 1], strides = [1, 1]} : vector<4x4xi32> to vector<4x1xi32>
    %3 = vector.broadcast %2 : vector<4x1xi32> to vector<4x672xi32>
    %4 = arith.cmpi eq, %1, %3 : vector<4x672xi32>
    %5 = vector.extract_strided_slice %0 {offsets = [0, 1], sizes = [4, 1], strides = [1, 1]} : vector<4x4xi32> to vector<4x1xi32>
    %6 = vector.broadcast %5 : vector<4x1xi32> to vector<4x672xi32>
    %7 = arith.cmpi eq, %1, %6 : vector<4x672xi32>
    %8 = arith.ori %4, %7 : vector<4x672xi1>
    %9 = vector.extract_strided_slice %0 {offsets = [0, 2], sizes = [4, 1], strides = [1, 1]} : vector<4x4xi32> to vector<4x1xi32>
    %10 = vector.broadcast %9 : vector<4x1xi32> to vector<4x672xi32>
    %11 = arith.cmpi eq, %1, %10 : vector<4x672xi32>
    %12 = arith.ori %8, %11 : vector<4x672xi1>
    %13 = vector.extract_strided_slice %0 {offsets = [0, 3], sizes = [4, 1], strides = [1, 1]} : vector<4x4xi32> to vector<4x1xi32>
    %14 = vector.broadcast %13 : vector<4x1xi32> to vector<4x672xi32>
    %15 = arith.cmpi eq, %1, %14 : vector<4x672xi32>
    %16 = arith.ori %12, %15 : vector<4x672xi1>
    %17 = arith.extui %16 : vector<4x672xi1> to vector<4x672xi32>
    %18 = arith.sitofp %17 : vector<4x672xi32> to vector<4x672xf32>
    %c0_1 = arith.constant 0 : index
    %c0_2 = arith.constant 0 : index
    %19 = vector.load %arg2[%c0_1, %c0_2] : memref<672x128xf32, #tpu.memory_space<vmem>>, vector<672x128xf32>
    %cst = arith.constant dense<0.000000e+00> : vector<4x128xf32>
    %20 = tpu.matmul %18, %19, %cst {dimension_numbers = #tpu.dot_dimension_numbers<[1], [0], [0], [1], [0, 0, 1, 1], [], []>} : vector<4x672xf32>, vector<672x128xf32>, vector<4x128xf32> -> vector<4x128xf32>
    %c0_3 = arith.constant 0 : index
    %c0_4 = arith.constant 0 : index
    %21 = vector.load %arg3[%c0_3, %c0_4] : memref<4x128xf32, #tpu.memory_space<vmem>>, vector<4x128xf32>
    tpu.vector_store %arg3[%c0_3, %c0_4], %20 {strides = array<i32>} : memref<4x128xf32, #tpu.memory_space<vmem>>, vector<4x128xf32>,
    return
  }
  func.func @transform_0(%arg0: i32) -> (i32, i32) {
    %c0_i32 = arith.constant 0 : i32
    %c0_i32_0 = arith.constant 0 : i32
    return %arg0, %c0_i32 : i32, i32
  }
  func.func @transform_1(%arg0: i32) -> (i32, i32) {
    %c0_i32 = arith.constant 0 : i32
    %c0_i32_0 = arith.constant 0 : i32
    %c0_i32_1 = arith.constant 0 : i32
    return %c0_i32, %c0_i32_0 : i32, i32
  }
  func.func @transform_2(%arg0: i32) -> (i32, i32) {
    %c0_i32 = arith.constant 0 : i32
    %c0_i32_0 = arith.constant 0 : i32
    return %arg0, %c0_i32 : i32, i32
  }
}

</mosaic_0001>

<bundles_post_ra>
// kernel: temporal_node_feature.1
= control target key start
LH: loop header
LB: loop body
LE: loop exit
PB: predicated region body
PF: predicated region fallthrough
CT: control target
= control target key end

     0   :  { %v481_v0 = vmov 0   ;;  %v482_v2 = vmov 2   ;;  %v483_v6 = vmov 0.0   ;;  %v484_v10 = vmov 1   ;;  %s831_s0 = inlined_call_operand.vmem [shape: s32[4,4], index: 0, kind: input, shape index: {}]   ;;  %s832_s1 = inlined_call_operand.vmem [shape: f32[672,128], index: 1, kind: input, shape index: {}]   ;;  %s833_s2 = inlined_call_operand.vmem [shape: f32[4,128], index: 2, kind: output, shape index: {}]  }
   0x1   :  { %476 = vset.pattern.permute.xlu0 %v481_v0  ;;  %v11_v1 = vld [vmem:[%s831_s0] sm:$0xf]  ;;  %478 = vset.pattern.permute.xlu1 %v482_v2  ;;  %v164_v3 = vld [vmem:[%s832_s1 + $0x278] sm:$0xff]  ;;  %v115_v7 = vld [vmem:[%s832_s1 + $0xf0] sm:$0xff]  ;;  %v485_v11 = vmov 3   ;;  %v12_v59 = vlaneseq }
   0x2   :  { %20 = vperm.xlu0 %476, %v11_v1   ;;  %44 = vperm.xlu1 %478, %v11_v1   ;;  %v116_v4 = vld [vmem:[%s832_s1 + $0xf8] sm:$0xff]  ;;  %v163_v8 = vld [vmem:[%s832_s1 + $0x270] sm:$0xff]  ;;  %v114_v12 = vld [vmem:[%s832_s1 + $0xe8] sm:$0xff] }
   0x3   :  { %v100_v5 = vld [vmem:[%s832_s1 + $0x78] sm:$0xff]  ;;  %313 = vmatprep.subr.mxu0 %v483_v6  ;;  %400 = vmatprep.subr.mxu1 %v116_v4  ;;  %v99_v9 = vld [vmem:[%s832_s1 + $0x70] sm:$0xff]  ;;  %v162_v13 = vld [vmem:[%s832_s1 + $0x268] sm:$0xff]  ;;  %v686_v60 = vand.u32 127, %v12_v59 }
   0x4   :  { %314 = vmatpush1.msra.mxu0 %v164_v3  ;;  %401 = vmatpush3.msra.mxu1 %v100_v5  ;;  %v98_v14 = vld [vmem:[%s832_s1 + $0x68] sm:$0xff]  ;;  %v113_v15 = vld [vmem:[%s832_s1 + $0xe0] sm:$0xff]  ;;  %v112_v18 = vld [vmem:[%s832_s1 + $0xd8] sm:$0xff]  ;;  %v486_v3 = vmov 1.0  }
   0x5   :  { %315 = vmatprep.subr.mxu0 %v483_v6  ;;  %402 = vmatprep.subr.mxu1 %v115_v7  ;;  %v161_v16 = vld [vmem:[%s832_s1 + $0x260] sm:$0xff]  ;;  %v160_v19 = vld [vmem:[%s832_s1 + $0x258] sm:$0xff]  ;;  %v111_v21 = vld [vmem:[%s832_s1 + $0xd0] sm:$0xff]  ;;  %v14_v63 = vadd.s32 128, %v686_v60  ;;  %v18_v2 = vadd.s32 640, %v686_v60  ;;  %v16_v5 = vadd.s32 384, %v686_v60 }
   0x6   :  { %477 = vset.pattern.permute.xlu0 %v484_v10  ;;  %479 = vset.pattern.permute.xlu1 %v485_v11  ;;  %v97_v17 = vld [vmem:[%s832_s1 + $0x60] sm:$0xff]  ;;  %v96_v20 = vld [vmem:[%s832_s1 + $0x58] sm:$0xff]  ;;  %v159_v22 = vld [vmem:[%s832_s1 + $0x250] sm:$0xff] }
   0x7   :  { %29 = vperm.xlu0 %477, %v11_v1   ;;  %59 = vperm.xlu1 %479, %v11_v1   ;;  %v95_v23 = vld [vmem:[%s832_s1 + $0x50] sm:$0xff]  ;;  %v110_v24 = vld [vmem:[%s832_s1 + $0xc8] sm:$0xff]  ;;  %v109_v27 = vld [vmem:[%s832_s1 + $0xc0] sm:$0xff] }
   0x8   :  { %316 = vmatpush1.msra.mxu0 %v163_v8  ;;  %403 = vmatpush3.msra.mxu1 %v99_v9  ;;  %v158_v25 = vld [vmem:[%s832_s1 + $0x248] sm:$0xff]  ;;  %v157_v28 = vld [vmem:[%s832_s1 + $0x240] sm:$0xff]  ;;  %v108_v30 = vld [vmem:[%s832_s1 + $0xb8] sm:$0xff]  ;;  %v17_v9 = vadd.s32 512, %v686_v60 }
   0x9   :  { %317 = vmatprep.subr.mxu0 %v483_v6  ;;  %404 = vmatprep.subr.mxu1 %v114_v12  ;;  %v94_v26 = vld [vmem:[%s832_s1 + $0x48] sm:$0xff]  ;;  %v93_v29 = vld [vmem:[%s832_s1 + $0x40] sm:$0xff]  ;;  %v156_v31 = vld [vmem:[%s832_s1 + $0x238] sm:$0xff] }
   0xa   :  { %318 = vmatpush1.msra.mxu0 %v162_v13  ;;  %405 = vmatpush3.msra.mxu1 %v98_v14  ;;  %v92_v32 = vld [vmem:[%s832_s1 + $0x38] sm:$0xff]  ;;  %v107_v33 = vld [vmem:[%s832_s1 + $0xb0] sm:$0xff]  ;;  %v106_v36 = vld [vmem:[%s832_s1 + $0xa8] sm:$0xff] }
   0xb   :  { %319 = vmatprep.subr.mxu0 %v483_v6  ;;  %406 = vmatprep.subr.mxu1 %v113_v15  ;;  %v155_v34 = vld [vmem:[%s832_s1 + $0x230] sm:$0xff]  ;;  %v154_v37 = vld [vmem:[%s832_s1 + $0x228] sm:$0xff]  ;;  %v105_v39 = vld [vmem:[%s832_s1 + $0xa0] sm:$0xff] }
   0xc   :  { %320 = vmatpush1.msra.mxu0 %v161_v16  ;;  %407 = vmatpush3.msra.mxu1 %v97_v17  ;;  %v91_v35 = vld [vmem:[%s832_s1 + $0x30] sm:$0xff]  ;;  %v90_v38 = vld [vmem:[%s832_s1 + $0x28] sm:$0xff]  ;;  %v153_v40 = vld [vmem:[%s832_s1 + $0x220] sm:$0xff] }
   0xd   :  { %321 = vmatprep.subr.mxu0 %v483_v6  ;;  %408 = vmatprep.subr.mxu1 %v112_v18  ;;  %v89_v41 = vld [vmem:[%s832_s1 + $0x20] sm:$0xff]  ;;  %v104_v42 = vld [vmem:[%s832_s1 + $0x98] sm:$0xff]  ;;  %v103_v45 = vld [vmem:[%s832_s1 + $0x90] sm:$0xff] }
   0xe   :  { %322 = vmatpush1.msra.mxu0 %v160_v19  ;;  %409 = vmatpush3.msra.mxu1 %v96_v20  ;;  %v152_v43 = vld [vmem:[%s832_s1 + $0x218] sm:$0xff]  ;;  %v151_v46 = vld [vmem:[%s832_s1 + $0x210] sm:$0xff]  ;;  %v102_v48 = vld [vmem:[%s832_s1 + $0x88] sm:$0xff] }
   0xf   :  { %323 = vmatprep.subr.mxu0 %v483_v6  ;;  %410 = vmatprep.subr.mxu1 %v111_v21  ;;  %v88_v44 = vld [vmem:[%s832_s1 + $0x18] sm:$0xff]  ;;  %v87_v47 = vld [vmem:[%s832_s1 + $0x10] sm:$0xff]  ;;  %v150_v49 = vld [vmem:[%s832_s1 + $0x208] sm:$0xff] }
  0x10   :  { %324 = vmatpush1.msra.mxu0 %v159_v22  ;;  %411 = vmatpush3.msra.mxu1 %v95_v23  ;;  %v86_v50 = vld [vmem:[%s832_s1 + $0x8] sm:$0xff]  ;;  %v101_v51 = vld [vmem:[%s832_s1 + $0x80] sm:$0xff]  ;;  %v148_v54 = vld [vmem:[%s832_s1 + $0x1f8] sm:$0xff] }
  0x11   :  { %325 = vmatprep.subr.mxu0 %v483_v6  ;;  %412 = vmatprep.subr.mxu1 %v110_v24  ;;  %v149_v52 = vld [vmem:[%s832_s1 + $0x200] sm:$0xff]  ;;  %v168_v55 = vld [vmem:[%s832_s1 + $0x298] sm:$0xff]  ;;  %v167_v56 = vld [vmem:[%s832_s1 + $0x290] sm:$0xff] }
  0x12   :  { %326 = vmatpush1.msra.mxu0 %v158_v25  ;;  %413 = vmatpush3.msra.mxu1 %v94_v26  ;;  %v85_v53 = vld [vmem:[%s832_s1] sm:$0xff]  ;;  %v166_v57 = vld [vmem:[%s832_s1 + $0x288] sm:$0xff]  ;;  %v132_v4 = vld [vmem:[%s832_s1 + $0x178] sm:$0xff] }
  0x13   :  { %327 = vmatprep.subr.mxu0 %v483_v6  ;;  %414 = vmatprep.subr.mxu1 %v109_v27  ;;  %v165_v58 = vld [vmem:[%s832_s1 + $0x280] sm:$0xff]  ;;  %v147_v7 = vld [vmem:[%s832_s1 + $0x1f0] sm:$0xff]  ;;  %v146_v10 = vld [vmem:[%s832_s1 + $0x1e8] sm:$0xff] }
  0x14   :  { %328 = vmatpush1.msra.mxu0 %v157_v28  ;;  %415 = vmatpush3.msra.mxu1 %v93_v29  ;;  %v131_v8 = vld [vmem:[%s832_s1 + $0x170] sm:$0xff]  ;;  %v145_v13 = vld [vmem:[%s832_s1 + $0x1e0] sm:$0xff]  ;;  %v128_v15 = vld [vmem:[%s832_s1 + $0x158] sm:$0xff]  ;;  %v15_v29 = vadd.s32 256, %v686_v60 }
  0x15   :  { %329 = vmatprep.subr.mxu0 %v483_v6  ;;  %416 = vmatprep.subr.mxu1 %v108_v30  ;;  %v129_v14 = vld [vmem:[%s832_s1 + $0x160] sm:$0xff]  ;;  %v143_v16 = vld [vmem:[%s832_s1 + $0x1d0] sm:$0xff]  ;;  %v142_v18 = vld [vmem:[%s832_s1 + $0x1c8] sm:$0xff] }
  0x16   :  { %330 = vmatpush1.msra.mxu0 %v156_v31  ;;  %417 = vmatpush3.msra.mxu1 %v92_v32  ;;  %v127_v17 = vld [vmem:[%s832_s1 + $0x150] sm:$0xff]  ;;  %v126_v19 = vld [vmem:[%s832_s1 + $0x148] sm:$0xff]  ;;  %v141_v20 = vld [vmem:[%s832_s1 + $0x1c0] sm:$0xff] }
  0x17   :  { %331 = vmatprep.subr.mxu0 %v483_v6  ;;  %418 = vmatprep.subr.mxu1 %v107_v33  ;;  %v125_v21 = vld [vmem:[%s832_s1 + $0x140] sm:$0xff]  ;;  %v140_v22 = vld [vmem:[%s832_s1 + $0x1b8] sm:$0xff]  ;;  %v139_v24 = vld [vmem:[%s832_s1 + $0x1b0] sm:$0xff] }
  0x18   :  { %332 = vmatpush1.msra.mxu0 %v155_v34  ;;  %419 = vmatpush3.msra.mxu1 %v91_v35  ;;  %v124_v23 = vld [vmem:[%s832_s1 + $0x138] sm:$0xff]  ;;  %v123_v25 = vld [vmem:[%s832_s1 + $0x130] sm:$0xff]  ;;  %v138_v26 = vld [vmem:[%s832_s1 + $0x1a8] sm:$0xff] }
  0x19   :  { %333 = vmatprep.subr.mxu0 %v483_v6  ;;  %420 = vmatprep.subr.mxu1 %v106_v36  ;;  %v122_v27 = vld [vmem:[%s832_s1 + $0x128] sm:$0xff]  ;;  %v137_v28 = vld [vmem:[%s832_s1 + $0x1a0] sm:$0xff]  ;;  %v136_v31 = vld [vmem:[%s832_s1 + $0x198] sm:$0xff] }
  0x1a   :  { %334 = vmatpush1.msra.mxu0 %v154_v37  ;;  %421 = vmatpush3.msra.mxu1 %v90_v38  ;;  %v121_v30 = vld [vmem:[%s832_s1 + $0x120] sm:$0xff]  ;;  %v120_v32 = vld [vmem:[%s832_s1 + $0x118] sm:$0xff]  ;;  %v135_v33 = vld [vmem:[%s832_s1 + $0x190] sm:$0xff] }
  0x1b   :  { %335 = vmatprep.subr.mxu0 %v483_v6  ;;  %422 = vmatprep.subr.mxu1 %v105_v39  ;;  %v119_v34 = vld [vmem:[%s832_s1 + $0x110] sm:$0xff]  ;;  %v134_v35 = vld [vmem:[%s832_s1 + $0x188] sm:$0xff]  ;;  %v133_v37 = vld [vmem:[%s832_s1 + $0x180] sm:$0xff] }
  0x1c   :  { %336 = vmatpush1.msra.mxu0 %v153_v40  ;;  %423 = vmatpush3.msra.mxu1 %v89_v41  ;;  %v118_v36 = vld [vmem:[%s832_s1 + $0x108] sm:$0xff]  ;;  %v117_v38 = vld [vmem:[%s832_s1 + $0x100] sm:$0xff] }
  0x1d   :  { %337 = vmatprep.subr.mxu0 %v483_v6  ;;  %424 = vmatprep.subr.mxu1 %v104_v42 }
  0x1e   :  { %338 = vmatpush1.msra.mxu0 %v152_v43  ;;  %425 = vmatpush3.msra.mxu1 %v88_v44 }
  0x1f   :  { %339 = vmatprep.subr.mxu0 %v483_v6  ;;  %426 = vmatprep.subr.mxu1 %v103_v45 }
  0x20   :  { %340 = vmatpush1.msra.mxu0 %v151_v46  ;;  %427 = vmatpush3.msra.mxu1 %v87_v47 }
  0x21   :  { %341 = vmatprep.subr.mxu0 %v483_v6  ;;  %428 = vmatprep.subr.mxu1 %v102_v48 }
  0x22   :  { %342 = vmatpush1.msra.mxu0 %v150_v49  ;;  %429 = vmatpush3.msra.mxu1 %v86_v50 }
  0x23   :  { %343 = vmatprep.subr.mxu0 %v483_v6  ;;  %430 = vmatprep.subr.mxu1 %v101_v51 }
  0x24   :  { %344 = vmatpush1.msra.mxu0 %v149_v52  ;;  %431 = vmatpush3.msra.mxu1 %v85_v53 }
  0x25   :  { %369 = vmatprep.subr.mxu0 %v483_v6  ;;  %435 = vmatprep.subr.mxu1 %v148_v54 }
  0x26   :  { %370 = vmatpush2.msra.mxu0 %v168_v55  ;;  %480 = vset.pattern.permute.xlu0 %v485_v11  ;;  %v130_v11 = vld [vmem:[%s832_s1 + $0x168] sm:$0xff] }
  0x27   :  { %371 = vmatprep.subr.mxu0 %v483_v6 }
  0x28   :  { %372 = vmatpush2.msra.mxu0 %v167_v56 }
  0x29   :  { %373 = vmatprep.subr.mxu0 %v483_v6 }
  0x2a   :  { %374 = vmatpush2.msra.mxu0 %v166_v57 }
  0x2b   :  { %375 = vmatprep.subr.mxu0 %v483_v6 }
  0x2c   :  { %376 = vmatpush2.msra.mxu0 %v165_v58 }
  0x7d   :  { %v688_v61 = vpop.permute.xlu0 %20  ;;  %v690_v62 = vpop.permute.xlu1 %44 }
  0x7e   :  { %vm23_vm0 = vcmp.eq.s32.totalorder %v14_v63, %v688_v61  ;;  %vm47_vm4 = vcmp.eq.s32.totalorder %v14_v63, %v690_v62  ;;  %vm22_vm8 = vcmp.eq.s32.totalorder %v686_v60, %v688_v61  ;;  %vm46_vm11 = vcmp.eq.s32.totalorder %v686_v60, %v690_v62 }
  0x7f   :  { %vm27_vm15 = vcmp.eq.s32.totalorder %v18_v2, %v688_v61 }
  0x82   :  { %v693_v0 = vpop.permute.xlu0 %29  ;;  %v695_v1 = vpop.permute.xlu1 %59 }
  0x83   :  { %vm32_vm1 = vcmp.eq.s32.totalorder %v14_v63, %v693_v0  ;;  %vm62_vm2 = vcmp.eq.s32.totalorder %v14_v63, %v695_v1  ;;  %vm31_vm5 = vcmp.eq.s32.totalorder %v686_v60, %v693_v0  ;;  %vm61_vm9 = vcmp.eq.s32.totalorder %v686_v60, %v695_v1 }
  0x84   :  { %vm38_vm3 = vmor %vm23_vm0, %vm32_vm1  ;;  %vm36_vm12 = vcmp.eq.s32.totalorder %v18_v2, %v693_v0  ;;  %vm66_vm0 = vcmp.eq.s32.totalorder %v18_v2, %v695_v1 }
  0x85   :  { %vm53_vm6 = vmor %vm38_vm3, %vm47_vm4  ;;  %vm34_vm3 = vcmp.eq.s32.totalorder %v16_v5, %v693_v0 }
  0x86   :  { %vm68_vm7 = vmor %vm53_vm6, %vm62_vm2  ;;  %vm51_vm2 = vcmp.eq.s32.totalorder %v18_v2, %v690_v62 }
  0x87   :  { %394 = vmatprep.mubr.msk.f32.mxu1 %vm68_vm7, %v486_v3  ;;  %vm37_vm10 = vmor %vm22_vm8, %vm31_vm5  ;;  %vm169_vm5 = vcmask 261120   ;;  %vm25_vm7 = vcmp.eq.s32.totalorder %v16_v5, %v688_v61  ;;  %vm64_vm8 = vcmp.eq.s32.totalorder %v16_v5, %v695_v1 }
  0x88   :  { %vm52_vm13 = vmor %vm37_vm10, %vm46_vm11  ;;  %vm49_vm10 = vcmp.eq.s32.totalorder %v16_v5, %v690_v62  ;;  %vm35_vm11 = vcmp.eq.s32.totalorder %v17_v9, %v693_v0 }
  0x89   :  { %vm67_vm14 = vmor %vm52_vm13, %vm61_vm9 }
  0x8a   :  { %395 = vmatmul.mubr.msk.f32.vlgmr.msra.gmra.mxu1 %vm67_vm14, %v486_v3  ;;  %vm42_vm1 = vmor %vm27_vm15, %vm36_vm12  ;;  %vm26_vm14 = vcmp.eq.s32.totalorder %v17_v9, %v688_v61  ;;  %vm65_vm15 = vcmp.eq.s32.totalorder %v17_v9, %v695_v1 }
  0x8b   :  { %436 = vmatpush3.msra.mxu1 %v132_v4  ;;  %vm57_vm4 = vmor %vm42_vm1, %vm51_vm2  ;;  %vm50_vm1 = vcmp.eq.s32.totalorder %v17_v9, %v690_v62 }
  0x8c   :  { %vm72_vm6 = vmor %vm57_vm4, %vm66_vm0  ;;  %437 = vmatprep.subr.mxu1 %v147_v7  ;;  %vm33_vm4 = vcmp.eq.s32.totalorder %v15_v29, %v693_v0 }
  0x8d   :  { %v393_v12 = vsel %vm72_vm6, 1.0, %v483_v6  ;;  %vm40_vm9 = vmor %vm25_vm7, %vm34_vm3  ;;  %438 = vmatpush3.msra.mxu1 %v131_v8  ;;  %v144_v6 = vld [vmem:[%s832_s1 + $0x1d8] sm:$0xff]  ;;  %vm48_vm7 = vcmp.eq.s32.totalorder %v15_v29, %v690_v62 }
  0x8e   :  { %398 = vmatprep.mubr.msk.f32.mxu0 %vm169_vm5, %v393_v12  ;;  %vm55_vm12 = vmor %vm40_vm9, %vm49_vm10  ;;  %439 = vmatprep.subr.mxu1 %v146_v10  ;;  %vm24_vm5 = vcmp.eq.s32.totalorder %v15_v29, %v688_v61  ;;  %vm63_vm9 = vcmp.eq.s32.totalorder %v15_v29, %v695_v1 }
  0x8f   :  { %vm70_vm13 = vmor %vm55_vm12, %vm64_vm8  ;;  %440 = vmatpush3.msra.mxu1 %v130_v11 }
  0x90   :  { %396 = vmatprep.mubr.msk.f32.mxu1 %vm70_vm13, %v486_v3  ;;  %vm41_vm0 = vmor %vm26_vm14, %vm35_vm11  ;;  %441 = vmatprep.subr.mxu1 %v145_v13 }
  0x91   :  { %vm56_vm2 = vmor %vm41_vm0, %vm50_vm1  ;;  %442 = vmatpush3.msra.mxu1 %v129_v14 }
  0x92   :  { %vm71_vm3 = vmor %vm56_vm2, %vm65_vm15  ;;  %443 = vmatprep.subr.mxu1 %v144_v6 }
  0x93   :  { %399 = vmatmul.mubr.msk.f32.vlgmr.msra.gmra.mxu0 %vm71_vm3, %v486_v3  ;;  %444 = vmatpush3.msra.mxu1 %v128_v15  ;;  %vm39_vm6 = vmor %vm24_vm5, %vm33_vm4 }
  0x94   :  { %445 = vmatprep.subr.mxu1 %v143_v16  ;;  %vm54_vm8 = vmor %vm39_vm6, %vm48_vm7 }
  0x95   :  { %446 = vmatpush3.msra.mxu1 %v127_v17  ;;  %vm69_vm10 = vmor %vm54_vm8, %vm63_vm9 }
  0x96   :  { %447 = vmatprep.subr.mxu1 %v142_v18 }
  0x97   :  { %448 = vmatpush3.msra.mxu1 %v126_v19 }
  0x98   :  { %449 = vmatprep.subr.mxu1 %v141_v20 }
  0x99   :  { %450 = vmatpush3.msra.mxu1 %v125_v21 }
  0x9a   :  { %451 = vmatprep.subr.mxu1 %v140_v22 }
  0x9b   :  { %452 = vmatpush3.msra.mxu1 %v124_v23 }
  0x9c   :  { %453 = vmatprep.subr.mxu1 %v139_v24 }
  0x9d   :  { %454 = vmatpush3.msra.mxu1 %v123_v25 }
  0x9e   :  { %455 = vmatprep.subr.mxu1 %v138_v26 }
  0x9f   :  { %456 = vmatpush3.msra.mxu1 %v122_v27 }
  0xa0   :  { %457 = vmatprep.subr.mxu1 %v137_v28 }
  0xa1   :  { %458 = vmatpush3.msra.mxu1 %v121_v30 }
  0xa2   :  { %459 = vmatprep.subr.mxu1 %v136_v31 }
  0xa3   :  { %460 = vmatpush3.msra.mxu1 %v120_v32 }
  0xa4   :  { %461 = vmatprep.subr.mxu1 %v135_v33 }
  0xa5   :  { %462 = vmatpush3.msra.mxu1 %v119_v34 }
  0xa6   :  { %463 = vmatprep.subr.mxu1 %v134_v35 }
  0xa7   :  { %464 = vmatpush3.msra.mxu1 %v118_v36 }
  0xa8   :  { %465 = vmatprep.subr.mxu1 %v133_v37 }
  0xa9   :  { %466 = vmatpush3.msra.mxu1 %v117_v38 }
  0xaa   :  { %397 = vmatmul.mubr.msk.f32.vlgmr.msra.gmra.mxu1 %vm69_vm10, %v486_v3 }
 0x14a   :  { %v432_v41 = vpop.f32.mrf.mxu1 }
 0x14c   :  { %v433_v42 = vpop.f32.mrf.mxu1 }
 0x14d   :  { %v434_v45 = vadd.f32 %v433_v42, %v432_v41 }
 0x153   :  { %v379_v39 = vpop.f32.mrf.mxu0 }
 0x155   :  { %v381_v40 = vpop.f32.mrf.mxu0 }
 0x16a   :  { %v467_v43 = vpop.f32.mrf.mxu1 }
 0x16c   :  { %v468_v44 = vpop.f32.mrf.mxu1 }
 0x16d   :  { %v469_v46 = vadd.f32 %v468_v44, %v467_v43 }
 0x16f   :  { %v310_v47 = vadd.f32 %v469_v46, %v434_v45 }
 0x171   :  { %v380_v48 = vadd.f32 %v379_v39, %v310_v47 }
 0x173   :  { %383 = vst [vmem:[%s833_s2] sm:$0xf] %v380_v48 }

</bundles_post_ra>
